<compile_context>
chip_gen: v7x
topology: tpu7x:2x2x1
jax: 0.10.0
libtpu: 0.0.40
codegen_flags: <defaults>
</compile_context>

<pallas_src>
import jax
import jax.numpy as jnp
from jax.experimental import pallas as pl
from jax.experimental.pallas import tpu as pltpu


def _round_up(v, m):
    return (v + m - 1) // m * m


# ---------------------------------------------------------------------------
# Kernel 1: per-row feature transform (small matmuls, f32)
#   h_self = x @ W_self + b          (f32, the "self" half of the concat)
#   y      = x @ W_aggr              (stored bf16; feeds the N^2 matmul)
# ---------------------------------------------------------------------------
def transform_kernel(x_ref, ws_ref, wa_ref, b_ref, hself_ref, y_ref):
    xr = x_ref[...]                                              # (tm, F) f32
    hself_ref[...] = (
        jnp.dot(xr, ws_ref[...], preferred_element_type=jnp.float32)
        + b_ref[...])
    y = jnp.dot(xr, wa_ref[...], preferred_element_type=jnp.float32)
    y_ref[...] = y.astype(y_ref.dtype)


# ---------------------------------------------------------------------------
# Kernel 2: mean aggregation + update (dominant N^2 matmul, tiled)
#   acc_i  = sum_k adj[i, k] @ y[k]            (bf16 MXU, f32 accumulate)
#   out_i  = relu(h_self[i] + inv_deg[i] * acc_i)   (finalized at last k)
# ---------------------------------------------------------------------------
def aggregate_kernel(adj_ref, y_ref, hself_ref, invdeg_ref, o_ref, acc_ref):
    k = pl.program_id(1)

    @pl.when(k == 0)
    def _():
        acc_ref[...] = jnp.zeros_like(acc_ref)

    acc_ref[...] += jnp.dot(adj_ref[...], y_ref[...],
                            preferred_element_type=jnp.float32)

    @pl.when(k == pl.num_programs(1) - 1)
    def _():
        h = hself_ref[...] + acc_ref[...] * invdeg_ref[...]
        o_ref[...] = jnp.maximum(h, 0.0)


def graphsage_layer(x, adj, w, b, *, tile_m=256, tile_k=512):
    """x: (N, F) f32, adj: (N, N) f32 dense adjacency (adj[dst,src] = edge
    multiplicity), w: (O, 2F) f32 (torch Linear layout), b: (O,) f32."""
    N, F = x.shape
    O = w.shape[0]

    # Lane-dense padding of the output/feature-out dim and row padding so the
    # (8,128)-legal tiles evenly divide the arrays.
    O_pad = _round_up(O, 128)
    N_pad = _round_up(N, 128)
    if N_pad >= tile_k:
        N_pad = _round_up(N_pad, tile_k)     # tile_m (256) divides tile_k (512)
        tm, tk = tile_m, tile_k
    else:
        tm = tk = N_pad                      # small graph: single tile

    # Padded / preprocessed operands (all cheap, done once in the wrapper).
    x_p = jnp.zeros((N_pad, F), jnp.float32).at[:N, :].set(x)
    adj_p = jnp.zeros((N_pad, N_pad), jnp.float32).at[:N, :N].set(adj)

    deg = jnp.sum(adj_p, axis=1, keepdims=True)                  # (N_pad, 1)
    inv_deg = 1.0 / jnp.where(deg == 0.0, 1.0, deg)

    adj_bf16 = adj_p.astype(jnp.bfloat16)    # small-int multiplicities: exact

    # Split the torch-layout weight (O, 2F) into self/aggr halves, transposed
    # to (F, O) and padded to lane-dense (F, O_pad).
    w_self = jnp.zeros((F, O_pad), jnp.float32).at[:, :O].set(w[:, :F].T)
    w_aggr = jnp.zeros((F, O_pad), jnp.float32).at[:, :O].set(w[:, F:].T)
    b_p = jnp.zeros((1, O_pad), jnp.float32).at[0, :O].set(b)

    vmem_limit = 48 * 1024 * 1024            # safe headroom on v7x's 64 MiB

    # --- Pass 1: h_self = x @ W_self + b ; y = x @ W_aggr (bf16) ------------
    hself, y = pl.pallas_call(
        transform_kernel,
        out_shape=(jax.ShapeDtypeStruct((N_pad, O_pad), jnp.float32),
                   jax.ShapeDtypeStruct((N_pad, O_pad), jnp.bfloat16)),
        grid=(N_pad // tm,),
        in_specs=[
            pl.BlockSpec((tm, F), lambda i: (i, 0)),
            pl.BlockSpec((F, O_pad), lambda i: (0, 0)),
            pl.BlockSpec((F, O_pad), lambda i: (0, 0)),
            pl.BlockSpec((1, O_pad), lambda i: (0, 0)),
        ],
        out_specs=[
            pl.BlockSpec((tm, O_pad), lambda i: (i, 0)),
            pl.BlockSpec((tm, O_pad), lambda i: (i, 0)),
        ],
        compiler_params=pltpu.CompilerParams(
            dimension_semantics=("parallel",),
            vmem_limit_bytes=vmem_limit),
    )(x_p, w_self, w_aggr, b_p)

    # --- Pass 2: tiled adj @ y with f32 accumulator, scale + relu epilogue --
    out = pl.pallas_call(
        aggregate_kernel,
        out_shape=jax.ShapeDtypeStruct((N_pad, O_pad), jnp.float32),
        grid=(N_pad // tm, N_pad // tk),
        in_specs=[
            pl.BlockSpec((tm, tk), lambda i, k: (i, k)),       # adj tile
            pl.BlockSpec((tk, O_pad), lambda i, k: (k, 0)),    # y tile
            pl.BlockSpec((tm, O_pad), lambda i, k: (i, 0)),    # h_self tile
            pl.BlockSpec((tm, 1), lambda i, k: (i, 0)),        # inv_deg tile
        ],
        out_specs=pl.BlockSpec((tm, O_pad), lambda i, k: (i, 0)),
        scratch_shapes=[pltpu.VMEM((tm, O_pad), jnp.float32)],
        compiler_params=pltpu.CompilerParams(
            dimension_semantics=("parallel", "arbitrary"),
            vmem_limit_bytes=vmem_limit),
    )(adj_bf16, y, hself, inv_deg)

    return out[:N, :O]


def build_dense_adjacency(edge_index, num_nodes):
    """adj[dst, src] += 1 for each edge (matches scatter_add over edge_index[0])."""
    dst = edge_index[0]
    src = edge_index[1]
    adj = jnp.zeros((num_nodes, num_nodes), jnp.float32)
    return adj.at[dst, src].add(1.0)


def reference(x, adj, w, b):
    agg = adj @ x
    deg = jnp.sum(adj, axis=1, keepdims=True)
    deg = jnp.where(deg == 0.0, 1.0, deg)
    mean = agg / deg
    h = jnp.concatenate([x, mean], axis=1) @ w.T + b
    return jnp.maximum(h, 0.0)


if __name__ == "__main__":
    key = jax.random.PRNGKey(0)
    num_nodes = 8
    in_features = 16
    out_features = 32

    k_x, k_w, k_b = jax.random.split(key, 3)

    # node features
    x = jax.random.normal(k_x, (num_nodes, in_features), dtype=jnp.float32)

    # deterministic small graph: ring edges (both directions) plus a couple extras
    dst = jnp.array([0, 1, 2, 3, 4, 5, 6, 7, 1, 2, 3, 4, 5, 6, 7, 0, 0, 3],
                    dtype=jnp.int32)
    src = jnp.array([1, 2, 3, 4, 5, 6, 7, 0, 0, 1, 2, 3, 4, 5, 6, 7, 4, 6],
                    dtype=jnp.int32)
    edge_index = jnp.stack([dst, src], axis=0)     # (2, E)
    adj = build_dense_adjacency(edge_index, num_nodes)

    # nn.Linear(in_features*2, out_features) parameters, kaiming-uniform-like
    fan_in = 2 * in_features
    bound = 1.0 / jnp.sqrt(fan_in)
    w = jax.random.uniform(k_w, (out_features, 2 * in_features),
                           minval=-bound, maxval=bound, dtype=jnp.float32)
    b = jax.random.uniform(k_b, (out_features,),
                           minval=-bound, maxval=bound, dtype=jnp.float32)

    out = graphsage_layer(x, adj, w, b)
    out = jax.block_until_ready(out)

    ref = reference(x, adj, w, b)
    assert out.shape == (num_nodes, out_features)
    # The aggregation matmul runs with bf16 operands (f32 accumulation), so
    # compare against the pure-f32 reference at bf16-level tolerance.
    assert jnp.allclose(out, ref, atol=2e-2, rtol=2e-2), "mismatch vs reference"

    print("KERNEL_OK")
</pallas_src>

<mosaic_0001>
module attributes {stable_mosaic.version = 11 : i64} {
  func.func @transform_kernel(%arg0: i32, %arg1: memref<128x16xf32, #tpu.memory_space<vmem>>, %arg2: memref<16x128xf32, #tpu.memory_space<vmem>>, %arg3: memref<16x128xf32, #tpu.memory_space<vmem>>, %arg4: memref<1x128xf32, #tpu.memory_space<vmem>>, %arg5: memref<128x128xf32, #tpu.memory_space<vmem>>, %arg6: memref<128x128xbf16, #tpu.memory_space<vmem>>) attributes {dimension_semantics = [#tpu.dimension_semantics<parallel>], iteration_bounds = array<i64: 1>, scalar_prefetch = 0 : i64, scratch_operands = 0 : i64, tpu.core_type = #tpu.core_type<tc>, window_params = [{transform_indices = @transform_0, window_bounds = array<i64: 128, 16>}, {pipeline_mode = #tpu.pipeline_mode<synchronous>, transform_indices = @transform_1, window_bounds = array<i64: 16, 128>}, {pipeline_mode = #tpu.pipeline_mode<synchronous>, transform_indices = @transform_2, window_bounds = array<i64: 16, 128>}, {pipeline_mode = #tpu.pipeline_mode<synchronous>, transform_indices = @transform_3, window_bounds = array<i64: 1, 128>}, {transform_indices = @transform_4, window_bounds = array<i64: 128, 128>}, {transform_indices = @transform_5, window_bounds = array<i64: 128, 128>}]} {
    %c0 = arith.constant 0 : index
    %c0_0 = arith.constant 0 : index
    %0 = vector.load %arg1[%c0, %c0_0] : memref<128x16xf32, #tpu.memory_space<vmem>>, vector<128x16xf32>
    %c0_1 = arith.constant 0 : index
    %c0_2 = arith.constant 0 : index
    %1 = vector.load %arg2[%c0_1, %c0_2] : memref<16x128xf32, #tpu.memory_space<vmem>>, vector<16x128xf32>
    %cst = arith.constant dense<0.000000e+00> : vector<128x128xf32>
    %2 = tpu.matmul %0, %1, %cst {dimension_numbers = #tpu.dot_dimension_numbers<[1], [0], [0], [1], [0, 0, 1, 1], [], []>} : vector<128x16xf32>, vector<16x128xf32>, vector<128x128xf32> -> vector<128x128xf32>
    %c0_3 = arith.constant 0 : index
    %c0_4 = arith.constant 0 : index
    %3 = vector.load %arg4[%c0_3, %c0_4] : memref<1x128xf32, #tpu.memory_space<vmem>>, vector<1x128xf32>
    %4 = vector.broadcast %3 : vector<1x128xf32> to vector<128x128xf32>
    %5 = arith.addf %2, %4 : vector<128x128xf32>
    %c0_5 = arith.constant 0 : index
    %c0_6 = arith.constant 0 : index
    %6 = vector.load %arg5[%c0_5, %c0_6] : memref<128x128xf32, #tpu.memory_space<vmem>>, vector<128x128xf32>
    tpu.vector_store %arg5[%c0_5, %c0_6], %5 {strides = array<i32>} : memref<128x128xf32, #tpu.memory_space<vmem>>, vector<128x128xf32>,
    %c0_7 = arith.constant 0 : index
    %c0_8 = arith.constant 0 : index
    %7 = vector.load %arg3[%c0_7, %c0_8] : memref<16x128xf32, #tpu.memory_space<vmem>>, vector<16x128xf32>
    %cst_9 = arith.constant dense<0.000000e+00> : vector<128x128xf32>
    %8 = tpu.matmul %0, %7, %cst_9 {dimension_numbers = #tpu.dot_dimension_numbers<[1], [0], [0], [1], [0, 0, 1, 1], [], []>} : vector<128x16xf32>, vector<16x128xf32>, vector<128x128xf32> -> vector<128x128xf32>
    %9 = arith.truncf %8 : vector<128x128xf32> to vector<128x128xbf16>
    %c0_10 = arith.constant 0 : index
    %c0_11 = arith.constant 0 : index
    %10 = vector.load %arg6[%c0_10, %c0_11] : memref<128x128xbf16, #tpu.memory_space<vmem>>, vector<128x128xbf16>
    tpu.vector_store %arg6[%c0_10, %c0_11], %9 {strides = array<i32>} : memref<128x128xbf16, #tpu.memory_space<vmem>>, vector<128x128xbf16>,
    return
  }
  func.func @transform_0(%arg0: i32) -> (i32, i32) {
    %c0_i32 = arith.constant 0 : i32
    %c0_i32_0 = arith.constant 0 : i32
    return %arg0, %c0_i32 : i32, i32
  }
  func.func @transform_1(%arg0: i32) -> (i32, i32) {
    %c0_i32 = arith.constant 0 : i32
    %c0_i32_0 = arith.constant 0 : i32
    %c0_i32_1 = arith.constant 0 : i32
    return %c0_i32, %c0_i32_0 : i32, i32
  }
  func.func @transform_2(%arg0: i32) -> (i32, i32) {
    %c0_i32 = arith.constant 0 : i32
    %c0_i32_0 = arith.constant 0 : i32
    %c0_i32_1 = arith.constant 0 : i32
    return %c0_i32, %c0_i32_0 : i32, i32
  }
  func.func @transform_3(%arg0: i32) -> (i32, i32) {
    %c0_i32 = arith.constant 0 : i32
    %c0_i32_0 = arith.constant 0 : i32
    %c0_i32_1 = arith.constant 0 : i32
    return %c0_i32, %c0_i32_0 : i32, i32
  }
  func.func @transform_4(%arg0: i32) -> (i32, i32) {
    %c0_i32 = arith.constant 0 : i32
    %c0_i32_0 = arith.constant 0 : i32
    return %arg0, %c0_i32 : i32, i32
  }
  func.func @transform_5(%arg0: i32) -> (i32, i32) {
    %c0_i32 = arith.constant 0 : i32
    %c0_i32_0 = arith.constant 0 : i32
    return %arg0, %c0_i32 : i32, i32
  }
}

</mosaic_0001>

<bundles_post_ra>
// kernel: tpu_custom_call.1
= control target key start
LH: loop header
LB: loop body
LE: loop exit
PB: predicated region body
PF: predicated region fallthrough
CT: control target
= control target key end

     0   :  { %11 = vsyncpa [#allocation3], 0  ;;  %vm46_vm0 = vcmask 130048   ;;  %s961_s0 = inlined_call_operand.vmem [shape: f32[128,16], index: 0, kind: input, shape index: {}]   ;;  %s962_s1 = inlined_call_operand.vmem [shape: f32[16,128], index: 1, kind: input, shape index: {}]   ;;  %s963_s2 = inlined_call_operand.vmem [shape: f32[16,128], index: 2, kind: input, shape index: {}]   ;;  %s964_s3 = inlined_call_operand.vmem [shape: f32[1,128], index: 3, kind: input, shape index: {}]   ;;  %s965_s4 = inlined_call_operand.hbm [shape: f32[128,128], index: 4, kind: output, shape index: {0}]   ;;  %s966_s5 = inlined_call_operand.hbm [shape: bf16[128,128], index: 5, kind: output, shape index: {1}]  }
   0x1   :  { %v37_v0 = vld [vmem:[%s962_s1] sm:$0xff]  ;;  %v38_v1 = vld [vmem:[%s962_s1 + $0x8] sm:$0xff]  ;;  %v23_v8 = vld [vmem:[%s961_s0 + $0x10] sm:$0xff] }
   0x2   :  { %v256_v2 = vld [vmem:[%s963_s2] sm:$0xff]  ;;  %v719_v3 = vpack.c.bf16 %v38_v1, %v37_v0  ;;  %v257_v4 = vld [vmem:[%s963_s2 + $0x8] sm:$0xff] }
   0x3   :  { %v21_v5 = vld [vmem:[%s961_s0] sm:$0xff]  ;;  %v723_v6 = vpack.c.bf16 %v257_v4, %v256_v2  ;;  %v22_v7 = vld [vmem:[%s961_s0 + $0x8] sm:$0xff] }
   0x4   :  { %667 = vmatprep.mubr.msk.f32.mxu0 %vm46_vm0, %v21_v5  ;;  %695 = vmatprep.mubr.msk.f32.mxu1 %vm46_vm0, %v21_v5 }
   0x5   :  { %720 = vmatprep.subr.bf16.mxu0 %v719_v3  ;;  %724 = vmatprep.subr.bf16.mxu1 %v723_v6 }
   0x6   :  { %722 = vmatpush3.bf16.msra.mxu0 %v719_v3  ;;  %726 = vmatpush3.bf16.msra.mxu1 %v723_v6 }
   0x7   :  { %12 = vsyncpa [#allocation5], 0  ;;  %v24_v9 = vld [vmem:[%s961_s0 + $0x18] sm:$0xff]  ;;  %v25_v10 = vld [vmem:[%s961_s0 + $0x20] sm:$0xff]  ;;  %s782_s6 = smov [#allocation4]  }
   0x8   :  { %v26_v11 = vld [vmem:[%s961_s0 + $0x28] sm:$0xff]  ;;  %v27_v12 = vld [vmem:[%s961_s0 + $0x30] sm:$0xff]  ;;  %v28_v13 = vld [vmem:[%s961_s0 + $0x38] sm:$0xff]  ;;  %s500_s7 = sshll.u32 %s782_s6, 4  ;;  %s930_s7 = int_to_ptr.vmem [resolvable:$true] %s500_s7 }
   0x9   :  { %668 = vmatmul.mubr.msk.f32.vlgmr.msra.gmra.mrb[0].mxu0 %vm46_vm0, %v22_v7  ;;  %696 = vmatmul.mubr.msk.f32.vlgmr.msra.gmra.mrb[0].mxu1 %vm46_vm0, %v22_v7  ;;  %v29_v14 = vld [vmem:[%s961_s0 + $0x40] sm:$0xff]  ;;  %v30_v15 = vld [vmem:[%s961_s0 + $0x48] sm:$0xff]  ;;  %v31_v16 = vld [vmem:[%s961_s0 + $0x50] sm:$0xff] }
   0xa   :  { %670 = vmatprep.mubr.msk.f32.mxu0 %vm46_vm0, %v23_v8  ;;  %698 = vmatprep.mubr.msk.f32.mxu1 %vm46_vm0, %v23_v8  ;;  %v32_v17 = vld [vmem:[%s961_s0 + $0x58] sm:$0xff]  ;;  %v33_v18 = vld [vmem:[%s961_s0 + $0x60] sm:$0xff]  ;;  %v34_v19 = vld [vmem:[%s961_s0 + $0x68] sm:$0xff] }
   0xb   :  { %v35_v20 = vld [vmem:[%s961_s0 + $0x70] sm:$0xff]  ;;  %v36_v21 = vld [vmem:[%s961_s0 + $0x78] sm:$0xff]  ;;  %v912_v22 = vld [vmem:[%s964_s3] ss:$0 sm:$0xff]  ;;  %s781_s0 = smov [#allocation2]  }
   0xc   :  { %s488_s3 = sshll.u32 %s781_s0, 4  ;;  %s489_s3 = int_to_ptr.vmem [resolvable:$true] %s488_s3 }
   0xd   :  { %671 = vmatmul.mubr.msk.f32.gmra.mrb[2].mxu0 %vm46_vm0, %v24_v9  ;;  %699 = vmatmul.mubr.msk.f32.gmra.mrb[2].mxu1 %vm46_vm0, %v24_v9  ;;  %s733_s8 = scalar_lea.vmem %s489_s3, 2048  ;;  %p738_p1 = scmp.lt.s32.totalorder %s489_s3, %s489_s3 }
   0xe   :  { %673 = vmatprep.mubr.msk.f32.mxu0 %vm46_vm0, %v25_v10  ;;  %701 = vmatprep.mubr.msk.f32.mxu1 %vm46_vm0, %v25_v10  ;;  %p734_p0 = scmp.ne.s32.totalorder %s489_s3, %s733_s8  ;;  %p739_p2 = scmp.lt.s32.totalorder %s733_s8, %s733_s8 }
  0x10   :  { %p740_p3 = por %p739_p2, %p738_p1 }
  0x11   :  { %674 = vmatmul.mubr.msk.f32.gmra.mrb[4].mxu0 %vm46_vm0, %v26_v11  ;;  %702 = vmatmul.mubr.msk.f32.gmra.mrb[4].mxu1 %vm46_vm0, %v26_v11 }
  0x12   :  { %676 = vmatprep.mubr.msk.f32.mxu0 %vm46_vm0, %v27_v12  ;;  %704 = vmatprep.mubr.msk.f32.mxu1 %vm46_vm0, %v27_v12  ;;  %p741_p4 = pnand %p740_p3, %p734_p0 }
  0x15   :  { %677 = vmatmul.mubr.msk.f32.gmra.mrb[6].mxu0 %vm46_vm0, %v28_v13  ;;  %705 = vmatmul.mubr.msk.f32.gmra.mrb[6].mxu1 %vm46_vm0, %v28_v13 }
  0x16   :  { %679 = vmatprep.mubr.msk.f32.mxu0 %vm46_vm0, %v29_v14  ;;  %707 = vmatprep.mubr.msk.f32.mxu1 %vm46_vm0, %v29_v14 }
  0x19   :  { %680 = vmatmul.mubr.msk.f32.gmra.mrb[8].mxu0 %vm46_vm0, %v30_v15  ;;  %708 = vmatmul.mubr.msk.f32.gmra.mrb[8].mxu1 %vm46_vm0, %v30_v15 }
  0x1a   :  { %682 = vmatprep.mubr.msk.f32.mxu0 %vm46_vm0, %v31_v16  ;;  %710 = vmatprep.mubr.msk.f32.mxu1 %vm46_vm0, %v31_v16 }
  0x1d   :  { %683 = vmatmul.mubr.msk.f32.gmra.mrb[10].mxu0 %vm46_vm0, %v32_v17  ;;  %711 = vmatmul.mubr.msk.f32.gmra.mrb[10].mxu1 %vm46_vm0, %v32_v17 }
  0x1e   :  { %685 = vmatprep.mubr.msk.f32.mxu0 %vm46_vm0, %v33_v18  ;;  %713 = vmatprep.mubr.msk.f32.mxu1 %vm46_vm0, %v33_v18 }
  0x21   :  { %686 = vmatmul.mubr.msk.f32.gmra.mrb[12].mxu0 %vm46_vm0, %v34_v19  ;;  %714 = vmatmul.mubr.msk.f32.gmra.mrb[12].mxu1 %vm46_vm0, %v34_v19 }
  0x22   :  { %688 = vmatprep.mubr.msk.f32.mxu0 %vm46_vm0, %v35_v20  ;;  %716 = vmatprep.mubr.msk.f32.mxu1 %vm46_vm0, %v35_v20 }
  0x25   :  { %689 = vmatmul.mubr.msk.f32.gmra.mrb[14].mxu0 %vm46_vm0, %v36_v21  ;;  %717 = vmatmul.mubr.msk.f32.gmra.mrb[14].mxu1 %vm46_vm0, %v36_v21 }
  0xdc   :  { %v669_v23 = vpop.f32.mrb[0].mxu0  ;;  %v697_v25 = vpop.f32.mrb[0].mxu1 }
  0xdd   :  { %v167_v24 = vadd.f32 %v669_v23, %v912_v22  ;;  %v161_v26 = vpop.f32.mrb[1].mxu0  ;;  %v324_v28 = vpop.f32.mrb[1].mxu1 }
  0xde   :  { %v162_v27 = vadd.f32 %v912_v22, %v161_v26  ;;  %v583_v29 = vpack.c.bf16 %v697_v25, %v324_v28 }
  0xdf   :  { %241 = vst [vmem:[#allocation2 + $0x8] sm:$0xff] %v167_v24 }
  0xe0   :  { %240 = vst [vmem:[#allocation2] sm:$0xff] %v162_v27  ;;  %v672_v30 = vpop.f32.mrb[2].mxu0  ;;  %584 = vst [vmem:[#allocation4] sm:$0xff] %v583_v29   ;;  %v700_v32 = vpop.f32.mrb[2].mxu1 }
  0xe1   :  { %v177_v31 = vadd.f32 %v672_v30, %v912_v22  ;;  %v171_v33 = vpop.f32.mrb[3].mxu0  ;;  %v334_v35 = vpop.f32.mrb[3].mxu1 }
  0xe2   :  { %v172_v34 = vadd.f32 %v912_v22, %v171_v33  ;;  %v588_v36 = vpack.c.bf16 %v700_v32, %v334_v35 }
  0xe3   :  { %243 = vst [vmem:[#allocation2 + $0x18] sm:$0xff] %v177_v31 }
  0xe4   :  { %242 = vst [vmem:[#allocation2 + $0x10] sm:$0xff] %v172_v34  ;;  %v675_v37 = vpop.f32.mrb[4].mxu0  ;;  %620 = vst [vmem:[#allocation4 + $0x8] sm:$0xff] %v588_v36   ;;  %v703_v39 = vpop.f32.mrb[4].mxu1 }
  0xe5   :  { %v187_v38 = vadd.f32 %v675_v37, %v912_v22  ;;  %v181_v40 = vpop.f32.mrb[5].mxu0  ;;  %v344_v42 = vpop.f32.mrb[5].mxu1 }
  0xe6   :  { %v182_v41 = vadd.f32 %v912_v22, %v181_v40  ;;  %v593_v43 = vpack.c.bf16 %v703_v39, %v344_v42 }
  0xe7   :  { %245 = vst [vmem:[#allocation2 + $0x28] sm:$0xff] %v187_v38 }
  0xe8   :  { %244 = vst [vmem:[#allocation2 + $0x20] sm:$0xff] %v182_v41  ;;  %v678_v44 = vpop.f32.mrb[6].mxu0  ;;  %621 = vst [vmem:[#allocation4 + $0x10] sm:$0xff] %v593_v43   ;;  %v706_v46 = vpop.f32.mrb[6].mxu1 }
  0xe9   :  { %v197_v45 = vadd.f32 %v678_v44, %v912_v22  ;;  %v191_v47 = vpop.f32.mrb[7].mxu0  ;;  %v354_v49 = vpop.f32.mrb[7].mxu1 }
  0xea   :  { %v192_v48 = vadd.f32 %v912_v22, %v191_v47  ;;  %v598_v50 = vpack.c.bf16 %v706_v46, %v354_v49 }
  0xeb   :  { %247 = vst [vmem:[#allocation2 + $0x38] sm:$0xff] %v197_v45 }
  0xec   :  { %246 = vst [vmem:[#allocation2 + $0x30] sm:$0xff] %v192_v48  ;;  %v681_v51 = vpop.f32.mrb[8].mxu0  ;;  %622 = vst [vmem:[#allocation4 + $0x18] sm:$0xff] %v598_v50   ;;  %v709_v53 = vpop.f32.mrb[8].mxu1 }
  0xed   :  { %v207_v52 = vadd.f32 %v681_v51, %v912_v22  ;;  %v201_v54 = vpop.f32.mrb[9].mxu0  ;;  %v364_v56 = vpop.f32.mrb[9].mxu1 }
  0xee   :  { %v202_v55 = vadd.f32 %v912_v22, %v201_v54  ;;  %v603_v57 = vpack.c.bf16 %v709_v53, %v364_v56 }
  0xef   :  { %249 = vst [vmem:[#allocation2 + $0x48] sm:$0xff] %v207_v52 }
  0xf0   :  { %248 = vst [vmem:[#allocation2 + $0x40] sm:$0xff] %v202_v55  ;;  %v684_v58 = vpop.f32.mrb[10].mxu0  ;;  %623 = vst [vmem:[#allocation4 + $0x20] sm:$0xff] %v603_v57   ;;  %v712_v60 = vpop.f32.mrb[10].mxu1 }
  0xf1   :  { %v217_v59 = vadd.f32 %v684_v58, %v912_v22  ;;  %v211_v61 = vpop.f32.mrb[11].mxu0  ;;  %v374_v63 = vpop.f32.mrb[11].mxu1 }
  0xf2   :  { %v212_v62 = vadd.f32 %v912_v22, %v211_v61  ;;  %v608_v0 = vpack.c.bf16 %v712_v60, %v374_v63 }
  0xf3   :  { %251 = vst [vmem:[#allocation2 + $0x58] sm:$0xff] %v217_v59 }
  0xf4   :  { %250 = vst [vmem:[#allocation2 + $0x50] sm:$0xff] %v212_v62  ;;  %v687_v1 = vpop.f32.mrb[12].mxu0  ;;  %624 = vst [vmem:[#allocation4 + $0x28] sm:$0xff] %v608_v0   ;;  %v715_v3 = vpop.f32.mrb[12].mxu1 }
  0xf5   :  { %v227_v2 = vadd.f32 %v687_v1, %v912_v22  ;;  %v221_v4 = vpop.f32.mrb[13].mxu0  ;;  %v384_v6 = vpop.f32.mrb[13].mxu1 }
  0xf6   :  { %v222_v5 = vadd.f32 %v912_v22, %v221_v4  ;;  %v613_v7 = vpack.c.bf16 %v715_v3, %v384_v6 }
  0xf7   :  { %253 = vst [vmem:[#allocation2 + $0x68] sm:$0xff] %v227_v2 }
  0xf8   :  { %252 = vst [vmem:[#allocation2 + $0x60] sm:$0xff] %v222_v5  ;;  %v690_v8 = vpop.f32.mrb[14].mxu0  ;;  %625 = vst [vmem:[#allocation4 + $0x30] sm:$0xff] %v613_v7   ;;  %v718_v10 = vpop.f32.mrb[14].mxu1 }
  0xf9   :  { %v237_v9 = vadd.f32 %v690_v8, %v912_v22  ;;  %v231_v11 = vpop.f32.mrb[15].mxu0  ;;  %v394_v13 = vpop.f32.mrb[15].mxu1 }
  0xfa   :  { %v232_v12 = vadd.f32 %v912_v22, %v231_v11  ;;  %v618_v14 = vpack.c.bf16 %v718_v10, %v394_v13 }
  0xfb   :  { %255 = vst [vmem:[#allocation2 + $0x78] sm:$0xff] %v237_v9 }
  0xfc   :  { %254 = vst [vmem:[#allocation2 + $0x70] sm:$0xff] %v232_v12  ;;  %626 = vst [vmem:[#allocation4 + $0x38] sm:$0xff] %v618_v14  }
  0xfd   :  { %744 = shalt.err (!%p741_p4)
}
  0xfe   :  { %s745_s11 = scalar_lea.hbm %s965_s4, 2048 }
  0xff   :  { %p746_p5 = scmp.ne.s32.totalorder %s965_s4, %s745_s11  ;;  %p749_p6 = scmp.lt.u32.totalorder %s745_s11, %s965_s4 }
 0x101   :  { %p751_p7 = pnand %p749_p6, %p746_p5 }
 0x103   :  { %754 = shalt.err (!%p751_p7)
}
 0x104   :  { %s783_s16 = smov 128   ;;  %s784_s17 = smov 8  }
 0x105   :  { %494 = dma.vmem_to_hbm [thread:$0]  %s489_s3, 2048, %s965_s4, [#allocation3], %s783_s16, %s783_s16, %s784_s17  }
 0x106   :  { %s755_s20 = scalar_lea.vmem %s930_s7, 1024  ;;  %p760_p9 = scmp.lt.s32.totalorder %s930_s7, %s930_s7 }
 0x107   :  { %p756_p8 = scmp.ne.s32.totalorder %s930_s7, %s755_s20  ;;  %p761_p10 = scmp.lt.s32.totalorder %s755_s20, %s755_s20 }
 0x109   :  { %p762_p11 = por %p761_p10, %p760_p9 }
 0x10b   :  { %p763_p12 = pnand %p762_p11, %p756_p8 }
 0x10d   :  { %766 = shalt.err (!%p763_p12)
}
 0x10e   :  { %s767_s23 = scalar_lea.hbm %s966_s5, 1024 }
 0x10f   :  { %p768_p13 = scmp.ne.s32.totalorder %s966_s5, %s767_s23  ;;  %p771_p0 = scmp.lt.u32.totalorder %s767_s23, %s966_s5 }
 0x111   :  { %p773_p1 = pnand %p771_p0, %p768_p13 }
 0x113   :  { %776 = shalt.err (!%p773_p1)
}
 0x114   :  { %s785_s4 = smov 64   ;;  %s786_s1 = smov 4  }
 0x115   :  { %506 = dma.vmem_to_hbm [thread:$0]  %s930_s7, 1024, %s966_s5, [#allocation5], %s785_s4, %s785_s4, %s786_s1  }
 0x116   :  { %777 = dma.done.wait [#allocation3], 2048  }
 0x117   :  { %778 = vsyncadd [#allocation3], 4294965248 }
 0x118   :  { %779 = dma.done.wait [#allocation5], 1024  }
 0x119   :  { %780 = vsyncadd [#allocation5], 4294966272 }
 0x11a   :  { %513 = vsyncpa [#allocation3], 1 }
 0x11b   :  { %514 = vsyncpa [#allocation5], 1 }

</bundles_post_ra>
